<compile_context>
chip_gen: v7x
topology: tpu7x:2x2x1
jax: 0.10.0
libtpu: 0.0.40
codegen_flags: <defaults>
</compile_context>

<pallas_src>
import numpy as np

import jax
import jax.numpy as jnp
from jax.experimental import pallas as pl
from jax.experimental.pallas import tpu as pltpu


# ----------------------------- VMEM / tile sizing ------------------------------

_TILE_TARGET_BYTES = 8 * 1024 * 1024     # ~8 MiB hidden tile (x2 dbl-buffer in + out = 32 MiB)
_vmem_limit_cache = None


def _vmem_limit():
    """Generation-aware scoped VMEM limit: ~3/4 of physical VMEM
    (~48 MiB on v7x / 64 MiB phys, ~96 MiB on v5e/v6e / 128 MiB phys)."""
    global _vmem_limit_cache
    if _vmem_limit_cache is None:
        try:
            cap = pltpu.get_tpu_info().vmem_capacity_bytes
        except Exception:
            cap = 128 * 1024 * 1024
        _vmem_limit_cache = int(cap) * 3 // 4
    return _vmem_limit_cache


def _choose_tile(n, row_bytes, align):
    """Tile size along the packed sequence axis: full axis if small (always a legal
    block), else a multiple of `align` sized to ~_tile_target bytes."""
    return _choose_tile_t(n, row_bytes, align, _TILE_TARGET_BYTES)


def _choose_tile_t(n, row_bytes, align, target_bytes):
    if n * row_bytes <= target_bytes:
        return int(n)
    t = (target_bytes // row_bytes) // align * align
    return int(max(align, t))


# ----------------------------- Pallas kernels ------------------------------

def _stem_kernel(keep_ref, x_ref, null_ref, w_ref, b_ref, o_ref):
    # keep:(B0,1)  x:(B0,Dl)  null:(1,Dl)  w:(Dl,Ds)  b:(1,Ds)  ->  o:(B0,Ds) f32
    shape = x_ref.shape
    keep = jnp.broadcast_to(keep_ref[...] > 0.5, shape)
    null = jnp.broadcast_to(null_ref[...], shape)
    x = jnp.where(keep, x_ref[...], null)
    s = jnp.dot(x, w_ref[...], preferred_element_type=jnp.float32) + b_ref[...]
    o_ref[...] = s * jax.nn.sigmoid(s)                    # SiLU


def _film_params_kernel(stem_ref, w1_ref, b1_ref, w2_ref, b2p1_ref, o_ref):
    # stem:(B0,Ds)  w1:(Ds,H4)  b1:(1,H4)  w2:(H4,2D)  b2p1:(1,2D)  ->  o:(B0,2D)
    # w2 is the CONCATENATED scale|shift matrix (one MXU pass for both halves);
    # b2p1 has '+1' folded into the scale-half bias, so o = [scale+1, shift].
    g = jnp.dot(stem_ref[...], w1_ref[...], preferred_element_type=jnp.float32) + b1_ref[...]
    g = g * jax.nn.sigmoid(g)                             # SiLU
    o_ref[...] = jnp.dot(g, w2_ref[...], preferred_element_type=jnp.float32) + b2p1_ref[...]


def _mod_cl_kernel(scale_ref, shift_ref, h_ref, o_ref):
    # channel-last: scale/shift:(1,1,D)  h/o:(1,TN,D) — pure FMA in the hiddens dtype.
    o_ref[...] = h_ref[...] * scale_ref[...] + shift_ref[...]


def _mod_cf_kernel(scale_ref, shift_ref, h_ref, o_ref):
    # channel-first: scale/shift:(1,D,1)  h/o:(1,D,TN)  (n on lanes -> lane-dense stores).
    # TODO(synk): the (1,D,1) operand is lane-broadcast per tile; if the bundle shows the
    # XLU slot binding at large D, materialize a lane-broadcast form instead.
    o_ref[...] = h_ref[...] * scale_ref[...] + shift_ref[...]


# ----------------------------- kernel wrappers ------------------------------

def _stem(keep, x, null2, w, b2):
    B0, _ = x.shape
    Ds = w.shape[1]
    return pl.pallas_call(
        _stem_kernel,
        out_shape=jax.ShapeDtypeStruct((B0, Ds), jnp.float32),
        compiler_params=pltpu.CompilerParams(vmem_limit_bytes=_vmem_limit()),
    )(keep, x, null2, w, b2)


def _film_params(stem, w1, b1_r, w2, b2p1_r):
    B0 = stem.shape[0]
    out_dim = w2.shape[1]
    return pl.pallas_call(
        _film_params_kernel,
        out_shape=jax.ShapeDtypeStruct((B0, out_dim), jnp.float32),
        compiler_params=pltpu.CompilerParams(vmem_limit_bytes=_vmem_limit()),
    )(stem, w1, b1_r, w2, b2p1_r)


def _modulate_channel_last(scale_bd, shift_bd, hiddens_bnd, repeat, tile_target_bytes):
    B, N, D = hiddens_bnd.shape
    B0 = scale_bd.shape[0]
    assert B == B0 * repeat, f"hiddens batch {B} != text batch {B0} * repeat {repeat}"
    dt = hiddens_bnd.dtype
    itemsize = jnp.dtype(dt).itemsize
    scale3 = scale_bd.astype(dt).reshape(B0, 1, D)
    shift3 = shift_bd.astype(dt).reshape(B0, 1, D)
    r = repeat
    align = max(8, 32 // itemsize)                  # 8 f32 / 16 bf16 / 32 int8 sublanes
    tn = _choose_tile_t(N, D * itemsize, align, tile_target_bytes)
    grid = (B, pl.cdiv(N, tn))
    return pl.pallas_call(
        _mod_cl_kernel,
        out_shape=jax.ShapeDtypeStruct((B, N, D), dt),
        grid=grid,
        in_specs=[
            pl.BlockSpec((1, 1, D), lambda b, t: (b // r, 0, 0)),   # scale+1 (per text row)
            pl.BlockSpec((1, 1, D), lambda b, t: (b // r, 0, 0)),   # shift
            pl.BlockSpec((1, tn, D), lambda b, t: (b, t, 0)),       # hiddens (b, n, d)
        ],
        out_specs=pl.BlockSpec((1, tn, D), lambda b, t: (b, t, 0)),
        compiler_params=pltpu.CompilerParams(
            dimension_semantics=("parallel", "parallel"),           # no carried state
            vmem_limit_bytes=_vmem_limit()),
    )(scale3, shift3, hiddens_bnd)


def _modulate_channel_first(scale_bd, shift_bd, hiddens_bdn, repeat, tile_target_bytes):
    B, D, N = hiddens_bdn.shape
    B0 = scale_bd.shape[0]
    assert B == B0 * repeat, f"hiddens batch {B} != text batch {B0} * repeat {repeat}"
    dt = hiddens_bdn.dtype
    itemsize = jnp.dtype(dt).itemsize
    scale3 = scale_bd.astype(dt).reshape(B0, D, 1)
    shift3 = shift_bd.astype(dt).reshape(B0, D, 1)
    r = repeat
    tn = _choose_tile_t(N, D * itemsize, 128, tile_target_bytes)    # n on lanes
    grid = (B, pl.cdiv(N, tn))
    return pl.pallas_call(
        _mod_cf_kernel,
        out_shape=jax.ShapeDtypeStruct((B, D, N), dt),
        grid=grid,
        in_specs=[
            pl.BlockSpec((1, D, 1), lambda b, t: (b // r, 0, 0)),   # scale+1 (column)
            pl.BlockSpec((1, D, 1), lambda b, t: (b // r, 0, 0)),   # shift (column)
            pl.BlockSpec((1, D, tn), lambda b, t: (b, 0, t)),       # hiddens (b, d, n)
        ],
        out_specs=pl.BlockSpec((1, D, tn), lambda b, t: (b, 0, t)),
        compiler_params=pltpu.CompilerParams(
            dimension_semantics=("parallel", "parallel"),
            vmem_limit_bytes=_vmem_limit()),
    )(scale3, shift3, hiddens_bdn)


# ----------------------------- TextConditioner ------------------------------

def _cast_tuple(val, length=1):
    return val if isinstance(val, tuple) else (val,) * length


class TextConditionerPallas:
    """JAX/Pallas re-implementation of TextConditioner.forward.

    `embed_texts` (T5 / OpenCLIP adapters) has no Pallas equivalent; the caller
    supplies `text_embeds` of shape (batch, total_latent_dim) directly.
    """

    def __init__(self, key, *, hidden_dims, total_latent_dim,
                 cond_drop_prob=0.0, hiddens_channel_first=True,
                 text_embed_stem_dim_mult=2, tile_target_bytes=_TILE_TARGET_BYTES):
        self.hidden_dims = tuple(hidden_dims)
        self.num_condition_fns = len(self.hidden_dims)
        self.hiddens_channel_first = _cast_tuple(hiddens_channel_first,
                                                 self.num_condition_fns)
        self.cond_drop_prob = cond_drop_prob
        self.tile_target_bytes = tile_target_bytes
        Dl = total_latent_dim
        Ds = Dl * text_embed_stem_dim_mult
        self.total_latent_dim = Dl
        self.stem_dim = Ds

        keys = jax.random.split(key, 3 + 4 * self.num_condition_fns)
        s = 0.05
        self.null_text_embed = jax.random.normal(keys[0], (Dl,), jnp.float32)
        self.stem_w = s * jax.random.normal(keys[1], (Dl, Ds), jnp.float32)
        self.stem_b = s * jax.random.normal(keys[2], (Ds,), jnp.float32)

        # kernel layouts (precomputed once)
        self.null_2d = self.null_text_embed.reshape(1, Dl)
        self.stem_b2 = self.stem_b.reshape(1, Ds)

        self.film_params = []
        for i, hd in enumerate(self.hidden_dims):
            k1, k2, k3, k4 = keys[3 + 4 * i: 7 + 4 * i]
            H4 = hd * 4
            w1 = s * jax.random.normal(k1, (Ds, H4), jnp.float32)
            b1 = s * jax.random.normal(k2, (H4,), jnp.float32)
            # TODO(synk): original zero-inits this layer; non-zero used to exercise kernels.
            w2 = s * jax.random.normal(k3, (H4, 2 * hd), jnp.float32)   # [scale | shift] fused
            b2 = s * jax.random.normal(k4, (2 * hd,), jnp.float32)
            plus1 = jnp.concatenate([jnp.ones((hd,), jnp.float32),
                                     jnp.zeros((hd,), jnp.float32)])
            self.film_params.append(dict(
                w1=w1, b1=b1, w2=w2, b2=b2,                 # reference orientation
                b1_r=b1.reshape(1, H4),
                b2p1_r=(b2 + plus1).reshape(1, 2 * hd),     # '+1' folded into scale bias
            ))

    def forward(self, text_embeds, *, cond_drop_prob, repeat_batch=1, mask_key=None,
                tile_target_bytes=None):
        batch = text_embeds.shape[0]
        tile_target = tile_target_bytes if tile_target_bytes is not None else self.tile_target_bytes

        # prob_mask_like((batch, 1), 1 - cond_drop_prob): host-side RNG glue.
        if cond_drop_prob > 0.0:
            assert mask_key is not None
            keep = (jax.random.uniform(mask_key, (batch, 1)) <
                    (1.0 - cond_drop_prob)).astype(jnp.float32)
        else:
            keep = jnp.ones((batch, 1), jnp.float32)

        x = text_embeds.astype(jnp.float32)
        # Hoisted stem: ONE batched (B,Dl)x(Dl,Ds) pass, shared by all conditioners.
        stem = _stem(keep, x, self.null_2d, self.stem_w, self.stem_b2)

        repeat_batch = _cast_tuple(repeat_batch, self.num_condition_fns)
        cond_fns = []
        for hd, p, channel_first, r in zip(self.hidden_dims, self.film_params,
                                           self.hiddens_channel_first, repeat_batch):
            # Batched FiLM head for all text rows at once (scale & shift in one matmul).
            ss = _film_params(stem, p['w1'], p['b1_r'], p['w2'], p['b2p1_r'])
            scale_p1, shift = ss[:, :hd], ss[:, hd:]

            def cond_fn(hiddens, *, _hd=hd, _cf=channel_first, _r=r,
                        _scale=scale_p1, _shift=shift, _batch=batch, _tt=tile_target):
                assert hiddens.shape[0] == _batch * _r, (
                    f"hiddens batch {hiddens.shape[0]} != text batch {_batch} * repeat {_r}")
                if _cf:
                    b, d = hiddens.shape[0], hiddens.shape[1]
                    assert d == _hd, f'unexpected hidden dimension {d}'
                    h = hiddens.reshape(b, d, -1)                 # (b, d, n) -- no transpose
                    out = _modulate_channel_first(_scale, _shift, h, _r, _tt)
                    return out.reshape(hiddens.shape)
                else:
                    b, d = hiddens.shape[0], hiddens.shape[-1]
                    assert d == _hd, f'unexpected hidden dimension {d}'
                    h = hiddens.reshape(b, -1, d)                 # (b, n, d)
                    out = _modulate_channel_last(_scale, _shift, h, _r, _tt)
                    return out.reshape(hiddens.shape)

            cond_fns.append(cond_fn)
        return tuple(cond_fns)


# ----------------------------- pure-JAX reference ---------------------------

def _ref_cond(model, text_embeds, keep, hiddens, idx, repeat):
    silu = jax.nn.silu
    x = jnp.where(keep > 0.5, text_embeds, model.null_text_embed[None, :])
    stem = silu(x @ model.stem_w + model.stem_b)
    p = model.film_params[idx]
    hd = model.hidden_dims[idx]
    cond = jnp.repeat(stem, repeat, axis=0)
    g = silu(cond @ p['w1'] + p['b1'])
    ss = g @ p['w2'] + p['b2']
    scale, shift = ss[:, :hd], ss[:, hd:]
    if model.hiddens_channel_first[idx]:
        b, d = hiddens.shape[0], hiddens.shape[1]
        h = jnp.transpose(hiddens.reshape(b, d, -1), (0, 2, 1))
        o = h * (scale[:, None, :] + 1.0) + shift[:, None, :]
        return jnp.transpose(o, (0, 2, 1)).reshape(hiddens.shape)
    else:
        b, d = hiddens.shape[0], hiddens.shape[-1]
        h = hiddens.reshape(b, -1, d)
        o = h * (scale[:, None, :] + 1.0) + shift[:, None, :]
        return o.reshape(hiddens.shape)


# ----------------------------------- main -----------------------------------

if __name__ == "__main__":
    key = jax.random.PRNGKey(0)
    (k_model, k_embed, k_h1, k_h2, k_h3, k_h4, k_h5, k_mask) = jax.random.split(key, 8)

    batch = 2
    total_latent_dim = 24           # sum of synthetic text-model latent dims
    hidden_dims = (32, 16)
    hiddens_channel_first = (True, False)
    cond_drop_prob = 0.25

    model = TextConditionerPallas(
        k_model,
        hidden_dims=hidden_dims,
        total_latent_dim=total_latent_dim,
        cond_drop_prob=cond_drop_prob,
        hiddens_channel_first=hiddens_channel_first,
        text_embed_stem_dim_mult=2,
    )

    text_embeds = jax.random.normal(k_embed, (batch, total_latent_dim), jnp.float32)
    hiddens_cf = jax.random.normal(k_h1, (batch, 32, 4, 4), jnp.float32)   # (b, d, h, w)
    hiddens_cl = jax.random.normal(k_h2, (batch, 6, 16), jnp.float32)      # (b, n, d)

    cond_fns = model.forward(text_embeds, cond_drop_prob=cond_drop_prob,
                             repeat_batch=1, mask_key=k_mask)
    out_cf = jax.block_until_ready(cond_fns[0](hiddens_cf))
    out_cl = jax.block_until_ready(cond_fns[1](hiddens_cl))

    # repeat_batch path (each text row conditions r consecutive hidden rows)
    r = 2
    hiddens_cl_r = jax.random.normal(k_h3, (batch * r, 6, 16), jnp.float32)
    cond_fns_r = model.forward(text_embeds, cond_drop_prob=cond_drop_prob,
                               repeat_batch=(1, r), mask_key=k_mask)
    out_cl_r = jax.block_until_ready(cond_fns_r[1](hiddens_cl_r))

    # bf16 hiddens: exercises the dtype-native FMA and dtype-dependent tiling
    hiddens_cl_bf16 = jax.random.normal(k_h4, (batch, 6, 16), jnp.float32).astype(jnp.bfloat16)
    out_cl_bf16 = jax.block_until_ready(cond_fns[1](hiddens_cl_bf16))

    # multi-tile / partial-last-tile path (small tile target forces sequence tiling)
    hiddens_cf_big = jax.random.normal(k_h5, (batch, 32, 15, 20), jnp.float32)  # n = 300
    cond_fns_t = model.forward(text_embeds, cond_drop_prob=cond_drop_prob,
                               repeat_batch=1, mask_key=k_mask, tile_target_bytes=4096)
    out_cf_big = jax.block_until_ready(cond_fns_t[0](hiddens_cf_big))

    # reference checks (same keep mask as the kernel path)
    keep = (jax.random.uniform(k_mask, (batch, 1)) <
            (1.0 - cond_drop_prob)).astype(jnp.float32)
    ref_cf = _ref_cond(model, text_embeds, keep, hiddens_cf, 0, 1)
    ref_cl = _ref_cond(model, text_embeds, keep, hiddens_cl, 1, 1)
    ref_cl_r = _ref_cond(model, text_embeds, keep, hiddens_cl_r, 1, r)
    ref_cl_bf16 = _ref_cond(model, text_embeds, keep,
                            hiddens_cl_bf16.astype(jnp.float32), 1, 1)
    ref_cf_big = _ref_cond(model, text_embeds, keep, hiddens_cf_big, 0, 1)

    assert out_cf.shape == hiddens_cf.shape
    assert out_cl.shape == hiddens_cl.shape
    assert out_cl_r.shape == hiddens_cl_r.shape
    assert out_cl_bf16.dtype == jnp.bfloat16
    assert out_cf_big.shape == hiddens_cf_big.shape

    np.testing.assert_allclose(np.asarray(out_cf), np.asarray(ref_cf), rtol=1e-3, atol=1e-3)
    np.testing.assert_allclose(np.asarray(out_cl), np.asarray(ref_cl), rtol=1e-3, atol=1e-3)
    np.testing.assert_allclose(np.asarray(out_cl_r), np.asarray(ref_cl_r), rtol=1e-3, atol=1e-3)
    np.testing.assert_allclose(np.asarray(out_cf_big), np.asarray(ref_cf_big), rtol=1e-3, atol=1e-3)
    np.testing.assert_allclose(np.asarray(out_cl_bf16.astype(jnp.float32)),
                               np.asarray(ref_cl_bf16), rtol=5e-2, atol=5e-2)

    print("KERNEL_OK")
</pallas_src>

<mosaic_0001>
module attributes {stable_mosaic.version = 11 : i64} {
  func.func @_stem_kernel(%arg0: memref<2x1xf32, #tpu.memory_space<vmem>>, %arg1: memref<2x24xf32, #tpu.memory_space<vmem>>, %arg2: memref<1x24xf32, #tpu.memory_space<vmem>>, %arg3: memref<24x48xf32, #tpu.memory_space<vmem>>, %arg4: memref<1x48xf32, #tpu.memory_space<vmem>>, %arg5: memref<2x48xf32, #tpu.memory_space<vmem>>) attributes {dimension_semantics = [], scalar_prefetch = 0 : i64, scratch_operands = 0 : i64, tpu.core_type = #tpu.core_type<tc>} {
    %c0 = arith.constant 0 : index
    %c0_0 = arith.constant 0 : index
    %0 = vector.load %arg0[%c0, %c0_0] : memref<2x1xf32, #tpu.memory_space<vmem>>, vector<2x1xf32>
    %cst = arith.constant 5.000000e-01 : f32
    %1 = vector.broadcast %cst : f32 to vector<2x1xf32>
    %2 = arith.cmpf ogt, %0, %1 : vector<2x1xf32>
    %3 = vector.shape_cast %2 : vector<2x1xi1> to vector<2x1xi1>
    %4 = vector.broadcast %3 : vector<2x1xi1> to vector<2x24xi1>
    %c0_1 = arith.constant 0 : index
    %c0_2 = arith.constant 0 : index
    %5 = vector.load %arg2[%c0_1, %c0_2] : memref<1x24xf32, #tpu.memory_space<vmem>>, vector<1x24xf32>
    %6 = vector.shape_cast %5 : vector<1x24xf32> to vector<1x24xf32>
    %7 = vector.broadcast %6 : vector<1x24xf32> to vector<2x24xf32>
    %c0_3 = arith.constant 0 : index
    %c0_4 = arith.constant 0 : index
    %8 = vector.load %arg1[%c0_3, %c0_4] : memref<2x24xf32, #tpu.memory_space<vmem>>, vector<2x24xf32>
    %9 = arith.select %4, %8, %7 : vector<2x24xi1>, vector<2x24xf32>
    %c0_5 = arith.constant 0 : index
    %c0_6 = arith.constant 0 : index
    %10 = vector.load %arg3[%c0_5, %c0_6] : memref<24x48xf32, #tpu.memory_space<vmem>>, vector<24x48xf32>
    %cst_7 = arith.constant dense<0.000000e+00> : vector<2x48xf32>
    %11 = tpu.matmul %9, %10, %cst_7 {dimension_numbers = #tpu.dot_dimension_numbers<[1], [0], [0], [1], [0, 0, 1, 1], [], []>} : vector<2x24xf32>, vector<24x48xf32>, vector<2x48xf32> -> vector<2x48xf32>
    %c0_8 = arith.constant 0 : index
    %c0_9 = arith.constant 0 : index
    %12 = vector.load %arg4[%c0_8, %c0_9] : memref<1x48xf32, #tpu.memory_space<vmem>>, vector<1x48xf32>
    %13 = vector.broadcast %12 : vector<1x48xf32> to vector<2x48xf32>
    %14 = arith.addf %11, %13 : vector<2x48xf32>
    %15 = arith.negf %14 : vector<2x48xf32>
    %16 = math.exp %15 : vector<2x48xf32>
    %cst_10 = arith.constant 1.000000e+00 : f32
    %17 = vector.broadcast %cst_10 : f32 to vector<2x48xf32>
    %18 = arith.addf %17, %16 : vector<2x48xf32>
    %19 = arith.divf %17, %18 : vector<2x48xf32>
    %20 = arith.mulf %14, %19 : vector<2x48xf32>
    %c0_11 = arith.constant 0 : index
    %c0_12 = arith.constant 0 : index
    %21 = vector.load %arg5[%c0_11, %c0_12] : memref<2x48xf32, #tpu.memory_space<vmem>>, vector<2x48xf32>
    tpu.vector_store %arg5[%c0_11, %c0_12], %20 {strides = array<i32>} : memref<2x48xf32, #tpu.memory_space<vmem>>, vector<2x48xf32>,
    return
  }
}

</mosaic_0001>

<bundles_post_ra>
// kernel: tpu_custom_call.1
= control target key start
LH: loop header
LB: loop body
LE: loop exit
PB: predicated region body
PF: predicated region fallthrough
CT: control target
= control target key end

     0   :  { %10 = vsyncpa [#allocation3], 0  ;;  %s505_s0 = inlined_call_operand.hbm [shape: f32[2,1], index: 0, kind: input, shape index: {}]   ;;  %s506_s1 = inlined_call_operand.hbm [shape: f32[2,24], index: 1, kind: input, shape index: {}]   ;;  %s507_s2 = inlined_call_operand.hbm [shape: f32[1,24], index: 2, kind: input, shape index: {}]   ;;  %s508_s3 = inlined_call_operand.hbm [shape: f32[24,48], index: 3, kind: input, shape index: {}]   ;;  %s509_s4 = inlined_call_operand.hbm [shape: f32[1,48], index: 4, kind: input, shape index: {}]   ;;  %s510_s5 = inlined_call_operand.hbm [shape: f32[2,48], index: 5, kind: output, shape index: {}]  }
   0x1   :  { %11 = vsyncpa [#allocation6], 0 }
   0x2   :  { %12 = vsyncpa [#allocation9], 0 }
   0x3   :  { %13 = vsyncpa [#allocation4], 0  ;;  %s384_s18 = smov [#allocation5]   ;;  %s385_s20 = smov [#allocation8]  }
   0x4   :  { %s30_s19 = sshll.u32 %s384_s18, 4  ;;  %s49_s21 = sshll.u32 %s385_s20, 4  ;;  %s31_s19 = int_to_ptr.vmem [resolvable:$true] %s30_s19  ;;  %s426_s21 = int_to_ptr.vmem [resolvable:$true] %s49_s21 }
   0x5   :  { %s244_s24 = scalar_lea.hbm %s506_s1, 32 }
   0x6   :  { %p245_p0 = scmp.ne.s32.totalorder %s506_s1, %s244_s24  ;;  %p248_p1 = scmp.lt.u32.totalorder %s244_s24, %s506_s1 }
   0x8   :  { %p250_p2 = pnand %p248_p1, %p245_p0 }
   0xa   :  { %253 = shalt.err (!%p250_p2)
}
   0xb   :  { %s254_s29 = scalar_lea.vmem %s31_s19, 32  ;;  %p259_p4 = scmp.lt.s32.totalorder %s31_s19, %s31_s19 }
   0xc   :  { %p255_p3 = scmp.ne.s32.totalorder %s31_s19, %s254_s29  ;;  %p260_p5 = scmp.lt.s32.totalorder %s254_s29, %s254_s29 }
   0xe   :  { %p261_p6 = por %p260_p5, %p259_p4 }
  0x10   :  { %p262_p7 = pnand %p261_p6, %p255_p3 }
  0x12   :  { %265 = shalt.err (!%p262_p7)
}
  0x13   :  { %33 = dma.hbm_to_vmem [thread:$0]  %s506_s1, 32, %s31_s19, [#allocation6]  }
  0x14   :  { %s266_s9 = scalar_lea.hbm %s508_s3, 384 }
  0x15   :  { %p267_p8 = scmp.ne.s32.totalorder %s508_s3, %s266_s9  ;;  %p270_p9 = scmp.lt.u32.totalorder %s266_s9, %s508_s3 }
  0x17   :  { %p272_p10 = pnand %p270_p9, %p267_p8 }
  0x19   :  { %275 = shalt.err (!%p272_p10)
}
  0x1a   :  { %s276_s14 = scalar_lea.vmem %s426_s21, 384  ;;  %p281_p12 = scmp.lt.s32.totalorder %s426_s21, %s426_s21 }
  0x1b   :  { %p277_p11 = scmp.ne.s32.totalorder %s426_s21, %s276_s14  ;;  %p282_p13 = scmp.lt.s32.totalorder %s276_s14, %s276_s14 }
  0x1d   :  { %p283_p0 = por %p282_p13, %p281_p12 }
  0x1f   :  { %p284_p1 = pnand %p283_p0, %p277_p11 }
  0x21   :  { %287 = shalt.err (!%p284_p1)
}
  0x22   :  { %s386_s1 = smov 128   ;;  %s387_s15 = smov 8  }
  0x23   :  { %55 = dma.hbm_to_vmem [thread:$0]  %s508_s3, 384, %s426_s21, [#allocation9], %s386_s1, %s386_s1, %s387_s15  }
  0x24   :  { %s388_s18 = smov [#allocation2]   ;;  %s389_s20 = smov [#allocation7]  }
  0x25   :  { %s20_s19 = sshll.u32 %s388_s18, 4  ;;  %s40_s22 = sshll.u32 %s389_s20, 4  ;;  %s21_s19 = int_to_ptr.vmem [resolvable:$true] %s20_s19  ;;  %s41_s22 = int_to_ptr.vmem [resolvable:$true] %s40_s22 }
  0x26   :  { %s288_s25 = scalar_lea.hbm %s505_s0, 32 }
  0x27   :  { %p289_p2 = scmp.ne.s32.totalorder %s505_s0, %s288_s25  ;;  %p292_p3 = scmp.lt.u32.totalorder %s288_s25, %s505_s0 }
  0x29   :  { %p294_p4 = pnand %p292_p3, %p289_p2 }
  0x2b   :  { %297 = shalt.err (!%p294_p4)
}
  0x2c   :  { %s298_s3 = scalar_lea.vmem %s21_s19, 32  ;;  %p303_p6 = scmp.lt.s32.totalorder %s21_s19, %s21_s19 }
  0x2d   :  { %p299_p5 = scmp.ne.s32.totalorder %s21_s19, %s298_s3  ;;  %p304_p7 = scmp.lt.s32.totalorder %s298_s3, %s298_s3 }
  0x2f   :  { %p305_p8 = por %p304_p7, %p303_p6 }
  0x31   :  { %p306_p9 = pnand %p305_p8, %p299_p5 }
  0x33   :  { %309 = shalt.err (!%p306_p9)
}
  0x34   :  { %23 = dma.hbm_to_vmem [thread:$0]  %s505_s0, 32, %s21_s19, [#allocation3]  }
  0x35   :  { %s310_s8 = scalar_lea.hbm %s507_s2, 16 }
  0x36   :  { %p311_p10 = scmp.ne.s32.totalorder %s507_s2, %s310_s8  ;;  %p314_p11 = scmp.lt.u32.totalorder %s310_s8, %s507_s2 }
  0x38   :  { %p316_p12 = pnand %p314_p11, %p311_p10 }
  0x3a   :  { %319 = shalt.err (!%p316_p12)
}
  0x3b   :  { %s320_s13 = scalar_lea.vmem %s41_s22, 16  ;;  %s324_s14 = scalar_lea.vmem %s41_s22, 32 }
  0x3c   :  { %p321_p13 = scmp.ne.s32.totalorder %s41_s22, %s320_s13  ;;  %p325_p0 = scmp.lt.s32.totalorder %s41_s22, %s41_s22 }
  0x3d   :  { %p326_p1 = scmp.lt.s32.totalorder %s324_s14, %s320_s13 }
  0x3f   :  { %p327_p2 = por %p326_p1, %p325_p0 }
  0x41   :  { %p328_p3 = pnand %p327_p2, %p321_p13 }
  0x43   :  { %331 = shalt.err (!%p328_p3)
}
  0x44   :  { %43 = dma.hbm_to_vmem [thread:$0]  %s507_s2, 16, %s41_s22, [#allocation6]  }
  0x45   :  { %s390_s15 = smov [#allocation10]   ;;  %s332_s19 = scalar_lea.hbm %s509_s4, 16 }
  0x46   :  { %s62_s16 = sshll.u32 %s390_s15, 4  ;;  %p333_p4 = scmp.ne.s32.totalorder %s509_s4, %s332_s19  ;;  %s63_s16 = int_to_ptr.vmem [resolvable:$true] %s62_s16 }
  0x47   :  { %p336_p5 = scmp.lt.u32.totalorder %s332_s19, %s509_s4 }
  0x49   :  { %p338_p6 = pnand %p336_p5, %p333_p4 }
  0x4b   :  { %341 = shalt.err (!%p338_p6)
}
  0x4c   :  { %s342_s26 = scalar_lea.vmem %s63_s16, 16  ;;  %s346_s2 = scalar_lea.vmem %s63_s16, 32 }
  0x4d   :  { %p343_p7 = scmp.ne.s32.totalorder %s63_s16, %s342_s26  ;;  %p347_p8 = scmp.lt.s32.totalorder %s63_s16, %s63_s16 }
  0x4e   :  { %p348_p9 = scmp.lt.s32.totalorder %s346_s2, %s342_s26 }
  0x50   :  { %p349_p10 = por %p348_p9, %p347_p8 }
  0x52   :  { %p350_p11 = pnand %p349_p10, %p343_p7 }
  0x54   :  { %353 = shalt.err (!%p350_p11)
}
  0x55   :  { %65 = dma.hbm_to_vmem [thread:$0]  %s509_s4, 16, %s63_s16, [#allocation9]  }
  0x56   :  { %376 = dma.done.wait [#allocation3], 32  }
  0x57   :  { %377 = vsyncadd [#allocation3], 4294967264 }
  0x58   :  { %378 = dma.done.wait [#allocation6], 48  }
  0x59   :  { %379 = vsyncadd [#allocation6], 4294967248 }
  0x5a   :  { %380 = dma.done.wait [#allocation9], 400  }
  0x5b   :  { %381 = vsyncadd [#allocation9], 4294966896  ;;  %v391_v0 = vmov 0   ;;  %v392_v1 = vmov 0.0|0.0   ;;  %v81_v2 = vld [vmem:[#allocation2] sm:$0x3] }
  0x5c   :  { %239 = vset.pattern.permute.xlu0 %v391_v0  ;;  %224 = vmatprep.subr.bf16.mxu0 %v392_v1  ;;  %v97_v3 = vld [vmem:[#allocation8] sm:$0xff]  ;;  %v98_v4 = vld [vmem:[#allocation8 + $0x8] sm:$0xff]  ;;  %vm82_vm0 = vcmp.gt.f32.partialorder %v81_v2, 0.5  ;;  %v393_v7 = vmov 0.0   ;;  %v99_v8 = vld [vmem:[#allocation8 + $0x10] sm:$0xff]  ;;  %vm394_vm1 = vmmov 0  }
  0x5d   :  { %v225_v5 = vpack.c.bf16 %v98_v4, %v97_v3  ;;  %v83_v6 = vsel %vm82_vm0, 1, %v391_v0  ;;  %221 = vmatprep.mubr.msk.f32.mxu0 %vm394_vm1, %v393_v7  ;;  %v207_v9 = vld [vmem:[#allocation7] ss:$0 sm:$0xff]  ;;  %v95_v10 = vld [vmem:[#allocation5] sm:$0x3]  ;;  %vm107_vm2 = vcmask 195584  }
  0x5e   :  { %85 = vperm.xlu0 %239, %v83_v6   ;;  %v208_v13 = vld [vmem:[#allocation10] ss:$0 sm:$0xff]  ;;  %s395_s4 = smov [#allocation11]   ;;  %vm188_vm4 = vcmask 386048  }
  0x5f   :  { %226 = vmatpush3.bf16.msra.mxu0 %v225_v5  ;;  %s196_s28 = sshll.u32 %s395_s4, 4  ;;  %s197_s28 = int_to_ptr.vmem [resolvable:$true] %s196_s28 }
  0x60   :  { %219 = vmatprep.subr.mxu0 %v393_v7  ;;  %s354_s29 = scalar_lea.vmem %s197_s28, 32  ;;  %p359_p13 = scmp.lt.s32.totalorder %s197_s28, %s197_s28 }
  0x61   :  { %p355_p12 = scmp.ne.s32.totalorder %s197_s28, %s354_s29  ;;  %p360_p0 = scmp.lt.s32.totalorder %s354_s29, %s354_s29 }
  0x63   :  { %220 = vmatpush3.msra.mxu0 %v99_v8  ;;  %p361_p1 = por %p360_p0, %p359_p13 }
  0x65   :  { %p362_p2 = pnand %p361_p1, %p355_p12 }
  0xdd   :  { %v86_v11 = vpop.permute.xlu0 %85 }
  0xde   :  { %vm87_vm3 = vcmp.eq.s32.totalorder %v86_v11, 1 }
  0xdf   :  { %v96_v12 = vsel %vm87_vm3, %v95_v10, %v207_v9 }
  0xe0   :  { %222 = vmatmul.mubr.msk.f32.vlgmr.msra.gmra.mrb[0].mxu0 %vm107_vm2, %v96_v12 }
 0x1b3   :  { %v177_v14 = vpop.f32.mrb[0].mxu0 }
 0x1b4   :  { %v178_v15 = vadd.f32 %v208_v13, %v177_v14  ;;  %v223_v16 = vpop.f32.mrb[1].mxu0 }
 0x1b6   :  { %v210_v17 = vmul.f32 -1.442695, %v178_v15 }
 0x1b8   :  { %240 = vpow2.f32 %v210_v17 }
 0x1c2   :  { %v241_v18 = vpop.eup %240 }
 0x1c3   :  { %v184_v19 = vadd.f32 1.0, %v241_v18 }
 0x1c5   :  { %242 = vrcp.f32 %v184_v19 }
 0x1cf   :  { %v243_v20 = vpop.eup %242 }
 0x1d0   :  { %v187_v21 = vmul.f32 %v243_v20, %v178_v15 }
 0x1d2   :  { %189 = vst.msk [vmem:[#allocation11] sm:$0x3] %vm188_vm4, %v187_v21 }
 0x1d3   :  { %365 = shalt.err (!%p362_p2)
}
 0x1d4   :  { %s366_s30 = scalar_lea.hbm %s510_s5, 32 }
 0x1d5   :  { %p367_p3 = scmp.ne.s32.totalorder %s510_s5, %s366_s30  ;;  %p370_p4 = scmp.lt.u32.totalorder %s366_s30, %s510_s5 }
 0x1d7   :  { %p372_p5 = pnand %p370_p4, %p367_p3 }
 0x1d9   :  { %375 = shalt.err (!%p372_p5)
}
 0x1da   :  { %199 = dma.vmem_to_hbm [thread:$0]  %s197_s28, 32, %s510_s5, [#allocation4]  }
 0x1db   :  { %382 = dma.done.wait [#allocation4], 32  }
 0x1dc   :  { %383 = vsyncadd [#allocation4], 4294967264 }
 0x1dd   :  { %203 = vsyncpa [#allocation3], 1 }
 0x1de   :  { %204 = vsyncpa [#allocation6], 1 }
 0x1df   :  { %205 = vsyncpa [#allocation9], 1 }
 0x1e0   :  { %206 = vsyncpa [#allocation4], 1 }

</bundles_post_ra>
